<compile_context>
chip_gen: v6e
topology: v6e:2x2x1
jax: 0.10.0
libtpu: 0.0.40
codegen_flags: <defaults>
</compile_context>

<pallas_src>
import jax
import jax.numpy as jnp
from jax.experimental import pallas as pl
from jax.experimental.pallas import tpu as pltpu

_LANE = 128  # TPU lane width -- the output feature axis is padded to this.


def _round_up(x, m):
    return ((x + m - 1) // m) * m


# ---------------------------------------------------------------------------
# One-time parameter preparation (NOT in the per-step hot path).
# ---------------------------------------------------------------------------
def prepare_linear_params(w, b, *, compute_dtype=None):
    """Pad Out to a lane multiple, pre-transpose W to (In, Out_p), bias -> (1, Out_p).

    w: (Out, In)  torch.nn.Linear weight layout
    b: (Out,)
    Returns (w_t, b_row, out) where
      w_t:   (In, Out_p)  optionally cast to compute_dtype (e.g. bf16 for v6e/v7x)
      b_row: (1, Out_p)   kept f32 (the epilogue bias add stays f32)
      out:   original Out (so a consumer can slice the padded slab once, lazily)
    """
    out, _ = w.shape
    out_p = _round_up(out, _LANE)
    pad = out_p - out
    w_t = jnp.pad(w, ((0, pad), (0, 0))).T                     # (In, Out_p), one-time
    b_row = jnp.pad(b, ((0, pad),)).reshape(1, out_p).astype(jnp.float32)
    if compute_dtype is not None:
        w_t = w_t.astype(compute_dtype)
    return w_t, b_row, out


# ---------------------------------------------------------------------------
# Small-shape path: whole problem resident in VMEM, single invocation, no grid.
# (At LR's demo sizes the call is ~100% fixed overhead; a fused jnp.dot would
#  match it -- kept as the minimal correct Pallas path for tiny shapes.)
# ---------------------------------------------------------------------------
def _linear_small_kernel(x_ref, w_ref, b_ref, o_ref):
    # x: (B, In), w: (In, Out_p) pre-transposed, b: (1, Out_p), o: (B, Out_p)
    acc = jnp.dot(x_ref[...], w_ref[...], preferred_element_type=jnp.float32)
    o_ref[...] = (acc + b_ref[...]).astype(o_ref.dtype)


def linear_small(x, w_t, b_row):
    """Lane-dense y_padded = x @ w_t + b_row, shape (B, Out_p)."""
    B, _ = x.shape
    out_p = w_t.shape[1]
    return pl.pallas_call(
        _linear_small_kernel,
        out_shape=jax.ShapeDtypeStruct((B, out_p), x.dtype),
        in_specs=[
            pl.BlockSpec(memory_space=pltpu.MemorySpace.VMEM),  # x
            pl.BlockSpec(memory_space=pltpu.MemorySpace.VMEM),  # W^T (In, Out_p)
            pl.BlockSpec(memory_space=pltpu.MemorySpace.VMEM),  # bias row
        ],
        out_specs=pl.BlockSpec(memory_space=pltpu.MemorySpace.VMEM),
    )(x, w_t, b_row)


# ---------------------------------------------------------------------------
# Production-size path: 3-axis tiled grid, K last, f32 VMEM accumulator.
# ---------------------------------------------------------------------------
def _linear_tiled_kernel(x_ref, w_ref, b_ref, o_ref, acc_ref):
    k = pl.program_id(2)

    @pl.when(k == 0)
    def _():
        acc_ref[...] = jnp.zeros_like(acc_ref)

    acc_ref[...] += jnp.dot(x_ref[...], w_ref[...],
                            preferred_element_type=jnp.float32)

    @pl.when(k == pl.num_programs(2) - 1)
    def _():
        o_ref[...] = (acc_ref[...] + b_ref[...]).astype(o_ref.dtype)


def linear_tiled(x, w_t, b_row, *, tm=128, tn=256, tk=256):
    """Tiled y_padded = x @ w_t + b_row for shapes that don't fit VMEM whole.

    x:     (B, In)        (bf16 recommended on v6e/v7x)
    w_t:   (In, Out_p)    pre-transposed, lane-padded weight
    b_row: (1, Out_p)     f32 bias row
    """
    B, In = x.shape
    out_p = w_t.shape[1]
    assert B % tm == 0 and out_p % tn == 0 and In % tk == 0, \
        "demo tiled path requires tile-divisible shapes"
    grid = (B // tm, out_p // tn, In // tk)  # reduction (K) axis last

    return pl.pallas_call(
        _linear_tiled_kernel,
        out_shape=jax.ShapeDtypeStruct((B, out_p), x.dtype),
        grid_spec=pltpu.PrefetchScalarGridSpec(
            num_scalar_prefetch=0,
            grid=grid,
            in_specs=[
                pl.BlockSpec((tm, tk), lambda i, j, k: (i, k)),   # x tile
                # TODO(synk): if a profile shows exposed DMA on the W stream,
                # add pipeline_mode=pl.Buffered(3) here (drop back to 2 on v7x
                # if VMEM-bound against its 64 MiB).
                pl.BlockSpec((tk, tn), lambda i, j, k: (k, j)),   # W^T tile
                pl.BlockSpec((1, tn), lambda i, j, k: (0, j)),    # bias tile
            ],
            out_specs=pl.BlockSpec((tm, tn), lambda i, j, k: (i, j)),
            scratch_shapes=[pltpu.VMEM((tm, tn), jnp.float32)],   # f32 accumulator
        ),
        compiler_params=pltpu.CompilerParams(
            dimension_semantics=("parallel", "parallel", "arbitrary"),
        ),
    )(x, w_t, b_row)


if __name__ == "__main__":
    # ------------- small shapes consistent with LR(input_size, output_size) --
    batch, input_size, output_size = 8, 32, 16

    key = jax.random.PRNGKey(0)
    kx, kw, kb = jax.random.split(key, 3)
    bound = 1.0 / (input_size ** 0.5)
    w = jax.random.uniform(kw, (output_size, input_size),
                           minval=-bound, maxval=bound, dtype=jnp.float32)
    b = jax.random.uniform(kb, (output_size,),
                           minval=-bound, maxval=bound, dtype=jnp.float32)
    x = jax.random.normal(kx, (batch, input_size), dtype=jnp.float32)

    # One-time parameter prep (outside the jitted step).
    w_t, b_row, out_dim = prepare_linear_params(w, b)

    fwd_small = jax.jit(linear_small)
    out_padded = jax.block_until_ready(fwd_small(x, w_t, b_row))

    # Consumer-side slice of the lane-padded slab (once, outside the hot path).
    out = out_padded[:, :out_dim]
    ref = x @ w.T + b
    assert out.shape == (batch, output_size)
    assert jnp.allclose(out, ref, atol=1e-5, rtol=1e-5)

    # ------------- production-style tiled path (bf16 operands, f32 accum) ----
    Bp, Inp, Outp = 256, 512, 512
    k2x, k2w, k2b = jax.random.split(jax.random.PRNGKey(1), 3)
    bound2 = 1.0 / (Inp ** 0.5)
    w2 = jax.random.uniform(k2w, (Outp, Inp),
                            minval=-bound2, maxval=bound2, dtype=jnp.float32)
    b2 = jax.random.uniform(k2b, (Outp,),
                            minval=-bound2, maxval=bound2, dtype=jnp.float32)
    x2 = jax.random.normal(k2x, (Bp, Inp), dtype=jnp.float32)

    w2_t, b2_row, out2_dim = prepare_linear_params(w2, b2, compute_dtype=jnp.bfloat16)
    x2_bf16 = x2.astype(jnp.bfloat16)

    fwd_tiled = jax.jit(linear_tiled)
    out2 = jax.block_until_ready(fwd_tiled(x2_bf16, w2_t, b2_row))

    # Reference from the same bf16-cast operands (only summation order / final
    # bf16 store differ from the kernel's f32-accumulated result).
    ref2 = (x2_bf16.astype(jnp.float32) @ w2_t.astype(jnp.float32)) + b2_row
    assert out2.shape == (Bp, _round_up(Outp, _LANE))
    assert jnp.allclose(out2[:, :out2_dim].astype(jnp.float32),
                        ref2[:, :out2_dim], atol=1e-2, rtol=1e-2)

    print("KERNEL_OK")
</pallas_src>

<mosaic_0001>
module attributes {stable_mosaic.version = 11 : i64} {
  func.func @_linear_small_kernel(%arg0: memref<8x32xf32, #tpu.memory_space<vmem>>, %arg1: memref<32x128xf32, #tpu.memory_space<vmem>>, %arg2: memref<1x128xf32, #tpu.memory_space<vmem>>, %arg3: memref<8x128xf32, #tpu.memory_space<vmem>>) attributes {dimension_semantics = [], scalar_prefetch = 0 : i64, scratch_operands = 0 : i64, tpu.core_type = #tpu.core_type<tc>} {
    %c0 = arith.constant 0 : index
    %c0_0 = arith.constant 0 : index
    %0 = vector.load %arg0[%c0, %c0_0] : memref<8x32xf32, #tpu.memory_space<vmem>>, vector<8x32xf32>
    %c0_1 = arith.constant 0 : index
    %c0_2 = arith.constant 0 : index
    %1 = vector.load %arg1[%c0_1, %c0_2] : memref<32x128xf32, #tpu.memory_space<vmem>>, vector<32x128xf32>
    %cst = arith.constant dense<0.000000e+00> : vector<8x128xf32>
    %2 = tpu.matmul %0, %1, %cst {dimension_numbers = #tpu.dot_dimension_numbers<[1], [0], [0], [1], [0, 0, 1, 1], [], []>} : vector<8x32xf32>, vector<32x128xf32>, vector<8x128xf32> -> vector<8x128xf32>
    %c0_3 = arith.constant 0 : index
    %c0_4 = arith.constant 0 : index
    %3 = vector.load %arg2[%c0_3, %c0_4] : memref<1x128xf32, #tpu.memory_space<vmem>>, vector<1x128xf32>
    %4 = vector.broadcast %3 : vector<1x128xf32> to vector<8x128xf32>
    %5 = arith.addf %2, %4 : vector<8x128xf32>
    %c0_5 = arith.constant 0 : index
    %c0_6 = arith.constant 0 : index
    %6 = vector.load %arg3[%c0_5, %c0_6] : memref<8x128xf32, #tpu.memory_space<vmem>>, vector<8x128xf32>
    tpu.vector_store %arg3[%c0_5, %c0_6], %5 {strides = array<i32>} : memref<8x128xf32, #tpu.memory_space<vmem>>, vector<8x128xf32>,
    return
  }
}

</mosaic_0001>

<bundles_post_ra>
// kernel: linear_small.1
= control target key start
LH: loop header
LB: loop body
LE: loop exit
PB: predicated region body
PF: predicated region fallthrough
CT: control target
= control target key end

     0   :  { %8 = vsyncpa [#allocation3], 0  ;;  %s274_s0 = inlined_call_operand.hbm [shape: f32[8,32], index: 0, kind: input, shape index: {}]   ;;  %s275_s1 = inlined_call_operand.hbm [shape: f32[32,128], index: 1, kind: input, shape index: {}]   ;;  %s276_s2 = inlined_call_operand.vmem [shape: f32[1,128], index: 2, kind: input, shape index: {}]   ;;  %s277_s3 = inlined_call_operand.hbm [shape: f32[8,128], index: 3, kind: output, shape index: {}]  }
   0x1   :  { %9 = vsyncpa [#allocation6], 0 }
   0x2   :  { %10 = vsyncpa [#allocation4], 0  ;;  %s235_s12 = smov [#allocation2]   ;;  %s236_s14 = smov [#allocation5]  }
   0x3   :  { %s17_s13 = sshll.u32 %s235_s12, 4  ;;  %s26_s15 = sshll.u32 %s236_s14, 4  ;;  %s18_s13 = int_to_ptr.vmem [resolvable:$true] %s17_s13  ;;  %s27_s15 = int_to_ptr.vmem [resolvable:$true] %s26_s15 }
   0x4   :  { %s177_s16 = scalar_lea.vmem %s18_s13, 128  ;;  %p182_p1 = scmp.lt.s32.totalorder %s18_s13, %s18_s13 }
   0x5   :  { %p178_p0 = scmp.ne.s32.totalorder %s18_s13, %s177_s16  ;;  %p183_p2 = scmp.lt.s32.totalorder %s177_s16, %s177_s16 }
   0x7   :  { %p184_p3 = por %p183_p2, %p182_p1 }
   0x9   :  { %p185_p4 = pnand %p184_p3, %p178_p0 }
   0xb   :  { %188 = shalt.err (!%p185_p4)
}
   0xc   :  { %20 = dma.hbm_to_vmem [thread:$0]  %s274_s0, 128, %s18_s13, [#allocation3]  }
   0xd   :  { %s197_s19 = scalar_lea.vmem %s27_s15, 512  ;;  %p202_p6 = scmp.lt.s32.totalorder %s27_s15, %s27_s15 }
   0xe   :  { %p198_p5 = scmp.ne.s32.totalorder %s27_s15, %s197_s19  ;;  %p203_p7 = scmp.lt.s32.totalorder %s197_s19, %s197_s19 }
  0x10   :  { %p204_p8 = por %p203_p7, %p202_p6 }
  0x12   :  { %p205_p9 = pnand %p204_p8, %p198_p5 }
  0x14   :  { %208 = shalt.err (!%p205_p9)
}
  0x15   :  { %s237_s20 = smov 128   ;;  %s238_s21 = smov 8  }
  0x16   :  { %32 = dma.hbm_to_vmem [thread:$0]  %s275_s1, 512, %s27_s15, [#allocation6], %s237_s20, %s237_s20, %s238_s21  }
  0x17   :  { %229 = dma.done.wait [#allocation3], 128  }
  0x18   :  { %230 = vsyncadd [#allocation3], 4294967168 }
  0x19   :  { %231 = dma.done.wait [#allocation6], 512  }
  0x1a   :  { %232 = vsyncadd [#allocation6], 4294966784  ;;  %v239_v0 = vmov 0.0   ;;  %vm240_vm0 = vmmov 0   ;;  %v45_v1 = vld [vmem:[#allocation5 + $0x18] sm:$0xff]  ;;  %v44_v2 = vld [vmem:[#allocation5 + $0x10] sm:$0xff] }
  0x1b   :  { %151 = vmatprep.subr.mxu0 %v239_v0  ;;  %159 = vmatprep.mubr.msk.f32.mxu0 %vm240_vm0, %v239_v0  ;;  %v43_v3 = vld [vmem:[#allocation5 + $0x8] sm:$0xff]  ;;  %v42_v4 = vld [vmem:[#allocation5] sm:$0xff]  ;;  %v41_v5 = vld [vmem:[#allocation2] sm:$0xff]  ;;  %vm53_vm1 = vcmask 261120   ;;  %s241_s24 = smov [#allocation7]  }
  0x1c   :  { %152 = vmatpush3.msra.mxu0 %v45_v1  ;;  %v144_v6 = vld [vmem:[%s276_s2] ss:$0 sm:$0xff]  ;;  %s134_s25 = sshll.u32 %s241_s24, 4  ;;  %s135_s25 = int_to_ptr.vmem [resolvable:$true] %s134_s25 }
  0x1d   :  { %153 = vmatprep.subr.mxu0 %v239_v0  ;;  %s209_s26 = scalar_lea.vmem %s135_s25, 128  ;;  %p214_p11 = scmp.lt.s32.totalorder %s135_s25, %s135_s25 }
  0x1e   :  { %154 = vmatpush3.msra.mxu0 %v44_v2  ;;  %p210_p10 = scmp.ne.s32.totalorder %s135_s25, %s209_s26  ;;  %p215_p12 = scmp.lt.s32.totalorder %s209_s26, %s209_s26 }
  0x1f   :  { %155 = vmatprep.subr.mxu0 %v239_v0 }
  0x20   :  { %156 = vmatpush3.msra.mxu0 %v43_v3  ;;  %p216_p13 = por %p215_p12, %p214_p11 }
  0x21   :  { %157 = vmatprep.subr.mxu0 %v239_v0 }
  0x22   :  { %158 = vmatpush3.msra.mxu0 %v42_v4  ;;  %p217_p0 = pnand %p216_p13, %p210_p10 }
  0x23   :  { %160 = vmatmul.mubr.msk.f32.vlgmr.msra.gmra.mxu0 %vm53_vm1, %v41_v5 }
  0xe3   :  { %v123_v7 = vpop.f32.mrf.mxu0 }
  0xe4   :  { %v124_v8 = vadd.f32 %v144_v6, %v123_v7 }
  0xe5   :  { %v161_v9 = vpop.f32.mrf.mxu0 }
  0xe6   :  { %127 = vst [vmem:[#allocation7] sm:$0xff] %v124_v8 }
  0xe7   :  { %220 = shalt.err (!%p217_p0)
}
  0xe8   :  { %137 = dma.vmem_to_hbm [thread:$0]  %s135_s25, 128, %s277_s3, [#allocation4]  }
  0xe9   :  { %233 = dma.done.wait [#allocation4], 128  }
  0xea   :  { %234 = vsyncadd [#allocation4], 4294967168 }
  0xeb   :  { %141 = vsyncpa [#allocation3], 1 }
  0xec   :  { %142 = vsyncpa [#allocation6], 1 }
  0xed   :  { %143 = vsyncpa [#allocation4], 1 }

</bundles_post_ra>
